<compile_context>
chip_gen: v7x
topology: tpu7x:2x2x1
jax: 0.10.0
libtpu: 0.0.40
codegen_flags: <defaults>
</compile_context>

<pallas_src>
import functools

import jax
import jax.numpy as jnp
from jax.experimental import pallas as pl
from jax.experimental.pallas import tpu as pltpu


def _modulator(one_minus_pt, gamma):
    """(1 - pt)**gamma, avoiding float pow for small integer gamma."""
    g = float(gamma)
    if g == 0.0:
        return jnp.ones_like(one_minus_pt)
    if g.is_integer() and 0 < g <= 8:
        out = one_minus_pt
        for _ in range(int(g) - 1):
            out = out * one_minus_pt
        return out
    return one_minus_pt ** g


def _focal_loss_kernel(x_ref, t_ref, out_ref, *, alpha, gamma, rows,
                       tile_rows, needs_mask):
    # Upcast to f32 in VMEM (inputs may be bf16 etc. -> low HBM traffic).
    x = x_ref[...].astype(jnp.float32)
    t = t_ref[...].astype(jnp.float32)

    # Numerically stable BCE-with-logits (matches PyTorch):
    #   bce = max(x, 0) - x*t + log(1 + exp(-|x|))
    bce = jnp.maximum(x, 0.0) - x * t + jnp.log1p(jnp.exp(-jnp.abs(x)))
    pt = jnp.exp(-bce)
    fl = alpha * _modulator(1.0 - pt, gamma) * bce

    if needs_mask:
        # Only the (possibly partial) last block has out-of-bounds rows; mask
        # them by global row index.  jnp.where is a select, so any garbage in
        # the padded region (even NaN/inf) is safely discarded.
        row_ids = (jax.lax.broadcasted_iota(jnp.int32, fl.shape, 0)
                   + pl.program_id(0) * tile_rows)
        fl = jnp.where(row_ids < rows, fl, 0.0)

    # Reduce the tile to an (8, 128) vreg-shaped partial with pure VPU adds.
    r, c = fl.shape
    pad_rows = (-r) % 8
    if pad_rows:  # only for tiny inputs with fewer than 8 rows
        fl = jnp.concatenate(
            [fl, jnp.zeros((pad_rows, c), jnp.float32)], axis=0)
    part = fl.reshape(-1, 8, c).sum(axis=0)
    out_ref[...] = part.reshape(1, 8, c)


def focal_loss(inputs, targets, alpha=0.25, gamma=2.0, *, tile_rows=1024):
    """Pallas TPU focal loss.  Returns a scalar float32 (the mean focal loss)."""
    assert inputs.shape == targets.shape
    lane = 128
    n_elems = int(inputs.size)

    # ravel of a contiguous array is a free reshape (no HBM copy).
    x = jnp.ravel(inputs)
    t = jnp.ravel(targets)

    rows = n_elems // lane
    rem = n_elems - rows * lane

    total = jnp.float32(0.0)

    if rows > 0:
        bulk = rows * lane
        # When rem == 0 (the common case) these slices are identity -> no copy.
        xb = x[:bulk].reshape(rows, lane)
        tb = t[:bulk].reshape(rows, lane)

        # Tile rows: as large as requested, multiple of 8, <= rows.
        if rows >= 8:
            tr = max(8, (min(int(tile_rows), rows) // 8) * 8)
        else:
            tr = rows  # block equals the full dim for sub-sublane inputs
        num_tiles = pl.cdiv(rows, tr)
        needs_mask = (rows % tr) != 0  # static: only then is a block partial

        kernel = functools.partial(
            _focal_loss_kernel, alpha=float(alpha), gamma=float(gamma),
            rows=rows, tile_rows=tr, needs_mask=needs_mask)

        tile_spec = pl.BlockSpec((tr, lane), lambda i: (i, 0))

        partials = pl.pallas_call(
            kernel,
            out_shape=jax.ShapeDtypeStruct((num_tiles, 8, lane), jnp.float32),
            grid=(num_tiles,),
            in_specs=[tile_spec, tile_spec],
            out_specs=pl.BlockSpec((1, 8, lane), lambda i: (i, 0, 0)),
            compiler_params=pltpu.CompilerParams(
                dimension_semantics=("parallel",)),
        )(xb, tb)

        total = total + jnp.sum(partials)

    if rem > 0:
        # Ragged tail of < 128 elements: negligible, handled in plain JAX.
        xt = x[rows * lane:].astype(jnp.float32)
        tt = t[rows * lane:].astype(jnp.float32)
        bce = jnp.maximum(xt, 0.0) - xt * tt + jnp.log1p(jnp.exp(-jnp.abs(xt)))
        pt = jnp.exp(-bce)
        total = total + jnp.sum(alpha * _modulator(1.0 - pt, gamma) * bce)

    return total / jnp.float32(n_elems)


def focal_loss_ref(inputs, targets, alpha=0.25, gamma=2.0):
    x = inputs.astype(jnp.float32)
    t = targets.astype(jnp.float32)
    bce = jnp.maximum(x, 0.0) - x * t + jnp.log1p(jnp.exp(-jnp.abs(x)))
    pt = jnp.exp(-bce)
    return jnp.mean(alpha * (1.0 - pt) ** gamma * bce)


if __name__ == "__main__":
    key = jax.random.PRNGKey(0)
    k1, k2 = jax.random.split(key)

    # Small shapes consistent with a typical segmentation / detection head.
    shape = (2, 4, 16, 16)  # NCHW-equivalent; loss is elementwise over all dims.
    logits = jax.random.normal(k1, shape, dtype=jnp.float32)
    targets = (jax.random.uniform(k2, shape) > 0.5).astype(jnp.float32)

    out = jax.block_until_ready(focal_loss(logits, targets))
    ref = jax.block_until_ready(focal_loss_ref(logits, targets))
    assert jnp.allclose(out, ref, rtol=1e-5, atol=1e-6), (out, ref)

    print("KERNEL_OK")
</pallas_src>

<mosaic_0001>
module attributes {stable_mosaic.version = 11 : i64} {
  func.func @_focal_loss_kernel(%arg0: i32, %arg1: memref<16x128xf32, #tpu.memory_space<vmem>>, %arg2: memref<16x128xf32, #tpu.memory_space<vmem>>, %arg3: memref<1x8x128xf32, #tpu.memory_space<vmem>>) attributes {dimension_semantics = [#tpu.dimension_semantics<parallel>], iteration_bounds = array<i64: 1>, scalar_prefetch = 0 : i64, scratch_operands = 0 : i64, tpu.core_type = #tpu.core_type<tc>, window_params = [{transform_indices = @transform_0, window_bounds = array<i64: 16, 128>}, {transform_indices = @transform_1, window_bounds = array<i64: 16, 128>}, {transform_indices = @transform_2, window_bounds = array<i64: 1, 8, 128>}]} {
    %c0 = arith.constant 0 : index
    %c0_0 = arith.constant 0 : index
    %0 = vector.load %arg1[%c0, %c0_0] : memref<16x128xf32, #tpu.memory_space<vmem>>, vector<16x128xf32>
    %c0_1 = arith.constant 0 : index
    %c0_2 = arith.constant 0 : index
    %1 = vector.load %arg2[%c0_1, %c0_2] : memref<16x128xf32, #tpu.memory_space<vmem>>, vector<16x128xf32>
    %cst = arith.constant 0.000000e+00 : f32
    %2 = vector.broadcast %cst : f32 to vector<16x128xf32>
    %3 = arith.maximumf %0, %2 : vector<16x128xf32>
    %4 = arith.mulf %0, %1 : vector<16x128xf32>
    %5 = arith.subf %3, %4 : vector<16x128xf32>
    %6 = math.absf %0 : vector<16x128xf32>
    %cst_3 = arith.constant 0.000000e+00 : f32
    %7 = vector.broadcast %cst_3 : f32 to vector<16x128xf32>
    %8 = arith.subf %7, %6 : vector<16x128xf32>
    %9 = math.exp %8 : vector<16x128xf32>
    %10 = math.log1p %9 : vector<16x128xf32>
    %11 = arith.addf %5, %10 : vector<16x128xf32>
    %cst_4 = arith.constant 0.000000e+00 : f32
    %12 = vector.broadcast %cst_4 : f32 to vector<16x128xf32>
    %13 = arith.subf %12, %11 : vector<16x128xf32>
    %14 = math.exp %13 : vector<16x128xf32>
    %cst_5 = arith.constant 1.000000e+00 : f32
    %15 = vector.broadcast %cst_5 : f32 to vector<16x128xf32>
    %16 = arith.subf %15, %14 : vector<16x128xf32>
    %17 = arith.mulf %16, %16 : vector<16x128xf32>
    %cst_6 = arith.constant 2.500000e-01 : f32
    %18 = vector.broadcast %cst_6 : f32 to vector<16x128xf32>
    %19 = arith.mulf %18, %17 : vector<16x128xf32>
    %20 = arith.mulf %19, %11 : vector<16x128xf32>
    %21 = vector.shape_cast %20 : vector<16x128xf32> to vector<2x8x128xf32>
    %cst_7 = arith.constant dense<0.000000e+00> : vector<8x128xf32>
    %22 = vector.multi_reduction <add>, %21, %cst_7 [0] : vector<2x8x128xf32> to vector<8x128xf32>
    %23 = vector.shape_cast %22 : vector<8x128xf32> to vector<1x8x128xf32>
    %c0_8 = arith.constant 0 : index
    %c0_9 = arith.constant 0 : index
    %c0_10 = arith.constant 0 : index
    %24 = vector.load %arg3[%c0_8, %c0_9, %c0_10] : memref<1x8x128xf32, #tpu.memory_space<vmem>>, vector<1x8x128xf32>
    tpu.vector_store %arg3[%c0_8, %c0_9, %c0_10], %23 {strides = array<i32>} : memref<1x8x128xf32, #tpu.memory_space<vmem>>, vector<1x8x128xf32>,
    return
  }
  func.func @transform_0(%arg0: i32) -> (i32, i32) {
    %c0_i32 = arith.constant 0 : i32
    %c0_i32_0 = arith.constant 0 : i32
    return %arg0, %c0_i32 : i32, i32
  }
  func.func @transform_1(%arg0: i32) -> (i32, i32) {
    %c0_i32 = arith.constant 0 : i32
    %c0_i32_0 = arith.constant 0 : i32
    return %arg0, %c0_i32 : i32, i32
  }
  func.func @transform_2(%arg0: i32) -> (i32, i32, i32) {
    %c0_i32 = arith.constant 0 : i32
    %c0_i32_0 = arith.constant 0 : i32
    %c0_i32_1 = arith.constant 0 : i32
    return %arg0, %c0_i32, %c0_i32_0 : i32, i32, i32
  }
}

</mosaic_0001>

<bundles_post_ra>
// kernel: tpu_custom_call.1
= control target key start
LH: loop header
LB: loop body
LE: loop exit
PB: predicated region body
PF: predicated region fallthrough
CT: control target
= control target key end

     0   :  { %7 = vsyncpa [#allocation3], 0  ;;  %s255_s0 = inlined_call_operand.hbm [shape: f32[16,128], index: 0, kind: input, shape index: {}]   ;;  %s256_s1 = inlined_call_operand.hbm [shape: f32[16,128], index: 1, kind: input, shape index: {}]   ;;  %s257_s2 = inlined_call_operand.hbm [shape: f32[1,8,128], index: 2, kind: output, shape index: {}]  }
   0x1   :  { %8 = vsyncpa [#allocation6], 0 }
   0x2   :  { %9 = vsyncpa [#allocation4], 0  ;;  %s199_s9 = smov [#allocation2]   ;;  %s127_s13 = scalar_lea.hbm %s255_s0, 256 }
   0x3   :  { %s15_s10 = sshll.u32 %s199_s9, 4  ;;  %p128_p0 = scmp.ne.s32.totalorder %s255_s0, %s127_s13  ;;  %s16_s10 = int_to_ptr.vmem [resolvable:$true] %s15_s10 }
   0x4   :  { %p131_p1 = scmp.lt.u32.totalorder %s127_s13, %s255_s0 }
   0x6   :  { %p133_p2 = pnand %p131_p1, %p128_p0 }
   0x8   :  { %136 = shalt.err (!%p133_p2)
}
   0x9   :  { %s137_s18 = scalar_lea.vmem %s16_s10, 256  ;;  %p142_p4 = scmp.lt.s32.totalorder %s16_s10, %s16_s10 }
   0xa   :  { %p138_p3 = scmp.ne.s32.totalorder %s16_s10, %s137_s18  ;;  %p143_p5 = scmp.lt.s32.totalorder %s137_s18, %s137_s18 }
   0xc   :  { %p144_p6 = por %p143_p5, %p142_p4 }
   0xe   :  { %p145_p7 = pnand %p144_p6, %p138_p3 }
  0x10   :  { %148 = shalt.err (!%p145_p7)
}
  0x11   :  { %s200_s19 = smov 128   ;;  %s201_s20 = smov 8  }
  0x12   :  { %21 = dma.hbm_to_vmem [thread:$0]  %s255_s0, 256, %s16_s10, [#allocation3], %s200_s19, %s200_s19, %s201_s20  }
  0x13   :  { %s202_s23 = smov [#allocation5]   ;;  %s149_s27 = scalar_lea.hbm %s256_s1, 256 }
  0x14   :  { %s27_s24 = sshll.u32 %s202_s23, 4  ;;  %p150_p8 = scmp.ne.s32.totalorder %s256_s1, %s149_s27  ;;  %s28_s24 = int_to_ptr.vmem [resolvable:$true] %s27_s24 }
  0x15   :  { %p153_p9 = scmp.lt.u32.totalorder %s149_s27, %s256_s1 }
  0x17   :  { %p155_p10 = pnand %p153_p9, %p150_p8 }
  0x19   :  { %158 = shalt.err (!%p155_p10)
}
  0x1a   :  { %s159_s4 = scalar_lea.vmem %s28_s24, 256  ;;  %p164_p12 = scmp.lt.s32.totalorder %s28_s24, %s28_s24 }
  0x1b   :  { %p160_p11 = scmp.ne.s32.totalorder %s28_s24, %s159_s4  ;;  %p165_p13 = scmp.lt.s32.totalorder %s159_s4, %s159_s4 }
  0x1d   :  { %p166_p0 = por %p165_p13, %p164_p12 }
  0x1f   :  { %p167_p1 = pnand %p166_p0, %p160_p11 }
  0x21   :  { %170 = shalt.err (!%p167_p1)
}
  0x22   :  { %33 = dma.hbm_to_vmem [thread:$0]  %s256_s1, 256, %s28_s24, [#allocation6], %s200_s19, %s200_s19, %s201_s20  }
  0x23   :  { %193 = dma.done.wait [#allocation3], 256  }
  0x24   :  { %194 = vsyncadd [#allocation3], 4294967040 }
  0x25   :  { %195 = dma.done.wait [#allocation6], 256  }
  0x26   :  { %196 = vsyncadd [#allocation6], 4294967040  ;;  %v40_v0 = vld [vmem:[#allocation2] sm:$0xff]  ;;  %v41_v1 = vld [vmem:[#allocation2 + $0x8] sm:$0xff]  ;;  %s203_s1 = smov [#allocation7]  }
  0x27   :  { %v50_v2 = vand.u32 2147483647, %v40_v0  ;;  %v51_v3 = vand.u32 2147483647, %v41_v1  ;;  %v42_v14 = vld [vmem:[#allocation5] sm:$0xff]  ;;  %v43_v15 = vld [vmem:[#allocation5 + $0x8] sm:$0xff] }
  0x28   :  { %v44_v17 = vmax.f32 %v40_v0, 0.0  ;;  %v46_v18 = vmul.f32 %v42_v14, %v40_v0  ;;  %v45_v21 = vmax.f32 %v41_v1, 0.0  ;;  %v47_v22 = vmul.f32 %v43_v15, %v41_v1  ;;  %s100_s6 = sshll.u32 %s203_s1, 4  ;;  %s101_s6 = int_to_ptr.vmem [resolvable:$true] %s100_s6 }
  0x29   :  { %v52_v4 = vsub.f32 0.0, %v50_v2  ;;  %v53_v5 = vsub.f32 0.0, %v51_v3  ;;  %s171_s7 = scalar_lea.vmem %s101_s6, 128  ;;  %p176_p3 = scmp.lt.s32.totalorder %s101_s6, %s101_s6 }
  0x2a   :  { %v48_v26 = vsub.f32 %v44_v17, %v46_v18  ;;  %v49_v29 = vsub.f32 %v45_v21, %v47_v22  ;;  %p172_p2 = scmp.ne.s32.totalorder %s101_s6, %s171_s7  ;;  %p177_p4 = scmp.lt.s32.totalorder %s171_s7, %s171_s7 }
  0x2b   :  { %v54_v6 = vmul.f32 1.442695, %v52_v4  ;;  %v56_v7 = vmul.f32 1.442695, %v53_v5 }
  0x2c   :  { %p178_p5 = por %p177_p4, %p176_p3 }
  0x2d   :  { %115 = vpow2.f32 %v54_v6 }
  0x2e   :  { %117 = vpow2.f32 %v56_v7  ;;  %p179_p6 = pnand %p178_p5, %p172_p2 }
  0x37   :  { %v116_v8 = vpop.eup %115 }
  0x38   :  { %v118_v9 = vpop.eup %117  ;;  %v58_v10 = vadd.f32 1.0, %v116_v8  ;;  %v61_v12 = vmul.f32 -0.5, %v116_v8  ;;  %v64_v19 = vand.u32 2147483647, %v116_v8 }
  0x39   :  { %v67_v11 = vadd.f32 1.0, %v118_v9  ;;  %v70_v13 = vmul.f32 -0.5, %v118_v9  ;;  %v73_v23 = vand.u32 2147483647, %v118_v9 }
  0x3a   :  { %119 = vlog2.f32 %v58_v10  ;;  %v62_v16 = vadd.f32 1.0, %v61_v12  ;;  %vm65_vm0 = vcmp.lt.f32.partialorder %v64_v19, 0.0004427343 }
  0x3b   :  { %121 = vlog2.f32 %v67_v11  ;;  %v71_v20 = vadd.f32 1.0, %v70_v13  ;;  %vm74_vm1 = vcmp.lt.f32.partialorder %v73_v23, 0.0004427343 }
  0x3c   :  { %v63_v24 = vmul.f32 %v116_v8, %v62_v16 }
  0x3d   :  { %v72_v27 = vmul.f32 %v118_v9, %v71_v20 }
  0x44   :  { %v120_v25 = vpop.eup %119 }
  0x45   :  { %v122_v28 = vpop.eup %121  ;;  %v60_v30 = vmul.f32 0.6931472, %v120_v25 }
  0x46   :  { %v69_v31 = vmul.f32 0.6931472, %v122_v28 }
  0x47   :  { %v66_v32 = vsel %vm65_vm0, %v63_v24, %v60_v30 }
  0x48   :  { %v75_v33 = vsel %vm74_vm1, %v72_v27, %v69_v31  ;;  %v76_v34 = vadd.f32 %v66_v32, %v48_v26 }
  0x49   :  { %v77_v35 = vadd.f32 %v75_v33, %v49_v29 }
  0x4a   :  { %v78_v36 = vsub.f32 0.0, %v76_v34 }
  0x4b   :  { %v79_v37 = vsub.f32 0.0, %v77_v35 }
  0x4c   :  { %v80_v38 = vmul.f32 1.442695, %v78_v36 }
  0x4d   :  { %v82_v39 = vmul.f32 1.442695, %v79_v37 }
  0x4e   :  { %123 = vpow2.f32 %v80_v38 }
  0x4f   :  { %125 = vpow2.f32 %v82_v39 }
  0x58   :  { %v124_v40 = vpop.eup %123 }
  0x59   :  { %v126_v41 = vpop.eup %125  ;;  %v84_v42 = vsub.f32 1.0, %v124_v40 }
  0x5a   :  { %v85_v43 = vsub.f32 1.0, %v126_v41 }
  0x5b   :  { %v86_v44 = vmul.f32 %v84_v42, %v84_v42 }
  0x5c   :  { %v87_v45 = vmul.f32 %v85_v43, %v85_v43 }
  0x5d   :  { %v88_v46 = vmul.f32 0.25, %v86_v44 }
  0x5e   :  { %v89_v47 = vmul.f32 0.25, %v87_v45 }
  0x5f   :  { %v90_v48 = vmul.f32 %v88_v46, %v76_v34 }
  0x60   :  { %v91_v49 = vmul.f32 %v89_v47, %v77_v35 }
  0x62   :  { %v92_v50 = vadd.f32 %v91_v49, %v90_v48 }
  0x64   :  { %93 = vst [vmem:[#allocation7] sm:$0xff] %v92_v50 }
  0x65   :  { %182 = shalt.err (!%p179_p6)
}
  0x66   :  { %s183_s10 = scalar_lea.hbm %s257_s2, 128 }
  0x67   :  { %p184_p7 = scmp.ne.s32.totalorder %s257_s2, %s183_s10  ;;  %p187_p8 = scmp.lt.u32.totalorder %s183_s10, %s257_s2 }
  0x69   :  { %p189_p9 = pnand %p187_p8, %p184_p7 }
  0x6b   :  { %192 = shalt.err (!%p189_p9)
}
  0x6c   :  { %103 = dma.vmem_to_hbm [thread:$0]  %s101_s6, 128, %s257_s2, [#allocation4]  }
  0x6d   :  { %197 = dma.done.wait [#allocation4], 128  }
  0x6e   :  { %198 = vsyncadd [#allocation4], 4294967168 }
  0x6f   :  { %107 = vsyncpa [#allocation3], 1 }
  0x70   :  { %108 = vsyncpa [#allocation6], 1 }
  0x71   :  { %109 = vsyncpa [#allocation4], 1 }

</bundles_post_ra>
